<compile_context>
chip_gen: v6e
topology: v6e:2x2x1
jax: 0.10.0
libtpu: 0.0.40
codegen_flags: <defaults>
</compile_context>

<pallas_src>
import functools

import jax
import jax.numpy as jnp
from jax.experimental import pallas as pl
from jax.experimental.pallas import tpu as pltpu


def _round_up(x: int, m: int) -> int:
    return (x + m - 1) // m * m


def _ae_kernel(x_ref, w1_ref, b1_ref, w2_ref, b2_ref,
               w3_ref, b3_ref, w4_ref, b4_ref,
               xhat_ref, z_ref):
    """Fused MLP autoencoder forward for one batch tile.

    x_ref:    (TN, Dp)  bf16   flattened input tile
    w1_ref:   (Dp, Hp)  bf16   b1: (1, Hp) f32   encoder layer 1
    w2_ref:   (Hp, Zp)  bf16   b2: (1, Zp) f32   encoder layer 2 (-> z)
    w3_ref:   (Zp, Hp)  bf16   b3: (1, Hp) f32   decoder layer 1
    w4_ref:   (Hp, Dp)  bf16   b4: (1, Dp) f32   decoder layer 2 (-> logits)
    xhat_ref: (TN, Dp)  f32    sigmoid(logits)
    z_ref:    (TN, Zp)  f32    latent code
    """
    x = x_ref[...]

    # Encoder
    h1 = jnp.dot(x, w1_ref[...], preferred_element_type=jnp.float32) + b1_ref[...]
    h1 = jnp.maximum(h1, 0.0).astype(w2_ref.dtype)
    z = jnp.dot(h1, w2_ref[...], preferred_element_type=jnp.float32) + b2_ref[...]
    z_ref[...] = z.astype(z_ref.dtype)

    # Decoder
    h2 = jnp.dot(z.astype(w3_ref.dtype), w3_ref[...],
                 preferred_element_type=jnp.float32) + b3_ref[...]
    h2 = jnp.maximum(h2, 0.0).astype(w4_ref.dtype)
    logits = jnp.dot(h2, w4_ref[...],
                     preferred_element_type=jnp.float32) + b4_ref[...]
    xhat_ref[...] = jax.nn.sigmoid(logits).astype(xhat_ref.dtype)


@functools.partial(jax.jit, static_argnames=("z_dim",))
def ae_forward(x_nchw, params, z_dim):
    """Returns (x_hat, z) with x_hat in NCHW, matching AE.forward."""
    n, c, h, w = x_nchw.shape
    d = c * h * w

    w1, b1, w2, b2, w3, b3, w4, b4 = params
    hidden = w1.shape[1]

    # Lane-align all feature dims (zero padding is value-preserving; ReLU(0)=0
    # keeps padded hidden lanes at 0, and padded z / x_hat columns are sliced
    # off before returning).
    lane = 128
    d_pad = _round_up(d, lane)
    h_pad = _round_up(hidden, lane)
    z_pad = _round_up(z_dim, lane)

    # Batch tiling: large enough for pipelining, clamped for tiny demo batches.
    # 16-row granularity keeps bf16 sublane packing happy.
    tile_n = min(512, _round_up(n, 16))
    n_pad = _round_up(n, tile_n)
    grid = (n_pad // tile_n,)

    x_flat = x_nchw.reshape(n, d).astype(jnp.bfloat16)
    x_flat = jnp.pad(x_flat, ((0, n_pad - n), (0, d_pad - d)))

    def pad2(a, rows, cols, dtype):
        return jnp.pad(a.astype(dtype),
                       ((0, rows - a.shape[0]), (0, cols - a.shape[1])))

    w1p = pad2(w1, d_pad, h_pad, jnp.bfloat16)
    b1p = pad2(b1, 1, h_pad, jnp.float32)
    w2p = pad2(w2, h_pad, z_pad, jnp.bfloat16)
    b2p = pad2(b2, 1, z_pad, jnp.float32)
    w3p = pad2(w3, z_pad, h_pad, jnp.bfloat16)
    b3p = pad2(b3, 1, h_pad, jnp.float32)
    w4p = pad2(w4, h_pad, d_pad, jnp.bfloat16)
    b4p = pad2(b4, 1, d_pad, jnp.float32)

    # VMEM budget derived from actual tile sizes (resident weights + double-
    # buffered x/xhat/z tiles + headroom), capped at 48 MiB so it is always
    # legal on v7x (64 MiB physical VMEM).
    bf2, f4 = 2, 4
    weight_bytes = ((d_pad * h_pad + h_pad * z_pad + z_pad * h_pad + h_pad * d_pad) * bf2
                    + (h_pad + z_pad + h_pad + d_pad) * f4)
    io_bytes = 2 * tile_n * (d_pad * bf2 + d_pad * f4 + z_pad * f4)
    vmem_limit = min(48 << 20,
                     max(16 << 20, int(1.5 * (weight_bytes + io_bytes)) + (2 << 20)))

    row_spec = lambda shape: pl.BlockSpec(shape, lambda i: (i, 0))
    resident = lambda shape: pl.BlockSpec(shape, lambda i: (0, 0))

    # TODO(synk): if D grows large enough that (D,H)/(H,D) no longer fit VMEM,
    # add a K-reduction grid axis ("arbitrary") with a VMEM accumulator.
    xhat_flat, z_full = pl.pallas_call(
        _ae_kernel,
        grid=grid,
        out_shape=(
            jax.ShapeDtypeStruct((n_pad, d_pad), jnp.float32),
            jax.ShapeDtypeStruct((n_pad, z_pad), jnp.float32),
        ),
        in_specs=[
            row_spec((tile_n, d_pad)),
            resident((d_pad, h_pad)), resident((1, h_pad)),
            resident((h_pad, z_pad)), resident((1, z_pad)),
            resident((z_pad, h_pad)), resident((1, h_pad)),
            resident((h_pad, d_pad)), resident((1, d_pad)),
        ],
        out_specs=(row_spec((tile_n, d_pad)), row_spec((tile_n, z_pad))),
        compiler_params=pltpu.CompilerParams(
            dimension_semantics=("parallel",),
            vmem_limit_bytes=vmem_limit,
        ),
    )(x_flat, w1p, b1p, w2p, b2p, w3p, b3p, w4p, b4p)

    x_hat = xhat_flat[:n, :d].reshape(n, c, h, w)
    z = z_full[:n, :z_dim]
    return x_hat, z


def recon_loss(x, x_hat):
    """F.mse_loss(x_hat, x, reduction='none').sum(dim=[1,2,3]) — plain JAX glue.

    (If only this loss were consumed downstream, the per-row squared error
    could be fused into the kernel epilogue to avoid the x_hat HBM round trip.)
    """
    return jnp.sum((x_hat - x) ** 2, axis=(1, 2, 3))


def init_params(key, d, hidden, z_dim):
    """Deterministic PyTorch-Linear-style init. Weights returned as (in, out), f32."""
    keys = jax.random.split(key, 8)

    def linear(kw, kb, fan_in, fan_out):
        bound = 1.0 / jnp.sqrt(fan_in)
        # torch.nn.Linear weight is (out, in); we build (in, out) directly.
        w = jax.random.uniform(kw, (fan_in, fan_out), jnp.float32, -bound, bound)
        b = jax.random.uniform(kb, (1, fan_out), jnp.float32, -bound, bound)
        return w, b

    w1, b1 = linear(keys[0], keys[1], d, hidden)
    w2, b2 = linear(keys[2], keys[3], hidden, z_dim)
    w3, b3 = linear(keys[4], keys[5], z_dim, hidden)
    w4, b4 = linear(keys[6], keys[7], hidden, d)
    return (w1, b1, w2, b2, w3, b3, w4, b4)


if __name__ == "__main__":
    key = jax.random.PRNGKey(0)
    k_x, k_p = jax.random.split(key)

    N, C, H, W = 2, 4, 16, 16
    Z_DIM = 10
    HIDDEN = 32
    D = C * H * W

    x = jax.random.uniform(k_x, (N, C, H, W), jnp.float32)  # image-like in [0,1)
    params = init_params(k_p, D, HIDDEN, Z_DIM)

    x_hat, z = ae_forward(x, params, Z_DIM)
    jax.block_until_ready((x_hat, z))

    assert x_hat.shape == (N, C, H, W), x_hat.shape
    assert z.shape == (N, Z_DIM), z.shape
    assert bool(jnp.all(jnp.isfinite(x_hat))) and bool(jnp.all(jnp.isfinite(z)))

    # exercise the loss path too (glue, not kernel)
    loss = jnp.mean(recon_loss(x, x_hat))
    jax.block_until_ready(loss)

    print("KERNEL_OK")
</pallas_src>

<mosaic_0001>
module attributes {stable_mosaic.version = 11 : i64} {
  func.func @_ae_kernel(%arg0: i32, %arg1: memref<16x1024xbf16, #tpu.memory_space<vmem>>, %arg2: memref<1024x128xbf16, #tpu.memory_space<vmem>>, %arg3: memref<1x128xf32, #tpu.memory_space<vmem>>, %arg4: memref<128x128xbf16, #tpu.memory_space<vmem>>, %arg5: memref<1x128xf32, #tpu.memory_space<vmem>>, %arg6: memref<128x128xbf16, #tpu.memory_space<vmem>>, %arg7: memref<1x128xf32, #tpu.memory_space<vmem>>, %arg8: memref<128x1024xbf16, #tpu.memory_space<vmem>>, %arg9: memref<1x1024xf32, #tpu.memory_space<vmem>>, %arg10: memref<16x1024xf32, #tpu.memory_space<vmem>>, %arg11: memref<16x128xf32, #tpu.memory_space<vmem>>) attributes {dimension_semantics = [#tpu.dimension_semantics<parallel>], iteration_bounds = array<i64: 1>, scalar_prefetch = 0 : i64, scratch_operands = 0 : i64, tpu.core_type = #tpu.core_type<tc>, window_params = [{transform_indices = @transform_0, window_bounds = array<i64: 16, 1024>}, {pipeline_mode = #tpu.pipeline_mode<synchronous>, transform_indices = @transform_1, window_bounds = array<i64: 1024, 128>}, {pipeline_mode = #tpu.pipeline_mode<synchronous>, transform_indices = @transform_2, window_bounds = array<i64: 1, 128>}, {pipeline_mode = #tpu.pipeline_mode<synchronous>, transform_indices = @transform_3, window_bounds = array<i64: 128, 128>}, {pipeline_mode = #tpu.pipeline_mode<synchronous>, transform_indices = @transform_4, window_bounds = array<i64: 1, 128>}, {pipeline_mode = #tpu.pipeline_mode<synchronous>, transform_indices = @transform_5, window_bounds = array<i64: 128, 128>}, {pipeline_mode = #tpu.pipeline_mode<synchronous>, transform_indices = @transform_6, window_bounds = array<i64: 1, 128>}, {pipeline_mode = #tpu.pipeline_mode<synchronous>, transform_indices = @transform_7, window_bounds = array<i64: 128, 1024>}, {pipeline_mode = #tpu.pipeline_mode<synchronous>, transform_indices = @transform_8, window_bounds = array<i64: 1, 1024>}, {transform_indices = @transform_9, window_bounds = array<i64: 16, 1024>}, {transform_indices = @transform_10, window_bounds = array<i64: 16, 128>}]} {
    %c0 = arith.constant 0 : index
    %c0_0 = arith.constant 0 : index
    %0 = vector.load %arg1[%c0, %c0_0] : memref<16x1024xbf16, #tpu.memory_space<vmem>>, vector<16x1024xbf16>
    %c0_1 = arith.constant 0 : index
    %c0_2 = arith.constant 0 : index
    %1 = vector.load %arg2[%c0_1, %c0_2] : memref<1024x128xbf16, #tpu.memory_space<vmem>>, vector<1024x128xbf16>
    %cst = arith.constant dense<0.000000e+00> : vector<16x128xf32>
    %2 = tpu.matmul %0, %1, %cst {dimension_numbers = #tpu.dot_dimension_numbers<[1], [0], [0], [1], [0, 0, 1, 1], [], []>} : vector<16x1024xbf16>, vector<1024x128xbf16>, vector<16x128xf32> -> vector<16x128xf32>
    %c0_3 = arith.constant 0 : index
    %c0_4 = arith.constant 0 : index
    %3 = vector.load %arg3[%c0_3, %c0_4] : memref<1x128xf32, #tpu.memory_space<vmem>>, vector<1x128xf32>
    %4 = vector.broadcast %3 : vector<1x128xf32> to vector<16x128xf32>
    %5 = arith.addf %2, %4 : vector<16x128xf32>
    %cst_5 = arith.constant 0.000000e+00 : f32
    %6 = vector.broadcast %cst_5 : f32 to vector<16x128xf32>
    %7 = arith.maximumf %5, %6 : vector<16x128xf32>
    %8 = arith.truncf %7 : vector<16x128xf32> to vector<16x128xbf16>
    %c0_6 = arith.constant 0 : index
    %c0_7 = arith.constant 0 : index
    %9 = vector.load %arg4[%c0_6, %c0_7] : memref<128x128xbf16, #tpu.memory_space<vmem>>, vector<128x128xbf16>
    %cst_8 = arith.constant dense<0.000000e+00> : vector<16x128xf32>
    %10 = tpu.matmul %8, %9, %cst_8 {dimension_numbers = #tpu.dot_dimension_numbers<[1], [0], [0], [1], [0, 0, 1, 1], [], []>} : vector<16x128xbf16>, vector<128x128xbf16>, vector<16x128xf32> -> vector<16x128xf32>
    %c0_9 = arith.constant 0 : index
    %c0_10 = arith.constant 0 : index
    %11 = vector.load %arg5[%c0_9, %c0_10] : memref<1x128xf32, #tpu.memory_space<vmem>>, vector<1x128xf32>
    %12 = vector.broadcast %11 : vector<1x128xf32> to vector<16x128xf32>
    %13 = arith.addf %10, %12 : vector<16x128xf32>
    %c0_11 = arith.constant 0 : index
    %c0_12 = arith.constant 0 : index
    %14 = vector.load %arg11[%c0_11, %c0_12] : memref<16x128xf32, #tpu.memory_space<vmem>>, vector<16x128xf32>
    tpu.vector_store %arg11[%c0_11, %c0_12], %13 {strides = array<i32>} : memref<16x128xf32, #tpu.memory_space<vmem>>, vector<16x128xf32>,
    %15 = arith.truncf %13 : vector<16x128xf32> to vector<16x128xbf16>
    %c0_13 = arith.constant 0 : index
    %c0_14 = arith.constant 0 : index
    %16 = vector.load %arg6[%c0_13, %c0_14] : memref<128x128xbf16, #tpu.memory_space<vmem>>, vector<128x128xbf16>
    %cst_15 = arith.constant dense<0.000000e+00> : vector<16x128xf32>
    %17 = tpu.matmul %15, %16, %cst_15 {dimension_numbers = #tpu.dot_dimension_numbers<[1], [0], [0], [1], [0, 0, 1, 1], [], []>} : vector<16x128xbf16>, vector<128x128xbf16>, vector<16x128xf32> -> vector<16x128xf32>
    %c0_16 = arith.constant 0 : index
    %c0_17 = arith.constant 0 : index
    %18 = vector.load %arg7[%c0_16, %c0_17] : memref<1x128xf32, #tpu.memory_space<vmem>>, vector<1x128xf32>
    %19 = vector.broadcast %18 : vector<1x128xf32> to vector<16x128xf32>
    %20 = arith.addf %17, %19 : vector<16x128xf32>
    %cst_18 = arith.constant 0.000000e+00 : f32
    %21 = vector.broadcast %cst_18 : f32 to vector<16x128xf32>
    %22 = arith.maximumf %20, %21 : vector<16x128xf32>
    %23 = arith.truncf %22 : vector<16x128xf32> to vector<16x128xbf16>
    %c0_19 = arith.constant 0 : index
    %c0_20 = arith.constant 0 : index
    %24 = vector.load %arg8[%c0_19, %c0_20] : memref<128x1024xbf16, #tpu.memory_space<vmem>>, vector<128x1024xbf16>
    %cst_21 = arith.constant dense<0.000000e+00> : vector<16x1024xf32>
    %25 = tpu.matmul %23, %24, %cst_21 {dimension_numbers = #tpu.dot_dimension_numbers<[1], [0], [0], [1], [0, 0, 1, 1], [], []>} : vector<16x128xbf16>, vector<128x1024xbf16>, vector<16x1024xf32> -> vector<16x1024xf32>
    %c0_22 = arith.constant 0 : index
    %c0_23 = arith.constant 0 : index
    %26 = vector.load %arg9[%c0_22, %c0_23] : memref<1x1024xf32, #tpu.memory_space<vmem>>, vector<1x1024xf32>
    %27 = vector.broadcast %26 : vector<1x1024xf32> to vector<16x1024xf32>
    %28 = arith.addf %25, %27 : vector<16x1024xf32>
    %29 = arith.negf %28 : vector<16x1024xf32>
    %30 = math.exp %29 : vector<16x1024xf32>
    %cst_24 = arith.constant 1.000000e+00 : f32
    %31 = vector.broadcast %cst_24 : f32 to vector<16x1024xf32>
    %32 = arith.addf %31, %30 : vector<16x1024xf32>
    %33 = arith.divf %31, %32 : vector<16x1024xf32>
    %c0_25 = arith.constant 0 : index
    %c0_26 = arith.constant 0 : index
    %34 = vector.load %arg10[%c0_25, %c0_26] : memref<16x1024xf32, #tpu.memory_space<vmem>>, vector<16x1024xf32>
    tpu.vector_store %arg10[%c0_25, %c0_26], %33 {strides = array<i32>} : memref<16x1024xf32, #tpu.memory_space<vmem>>, vector<16x1024xf32>,
    return
  }
  func.func @transform_0(%arg0: i32) -> (i32, i32) {
    %c0_i32 = arith.constant 0 : i32
    %c0_i32_0 = arith.constant 0 : i32
    return %arg0, %c0_i32 : i32, i32
  }
  func.func @transform_1(%arg0: i32) -> (i32, i32) {
    %c0_i32 = arith.constant 0 : i32
    %c0_i32_0 = arith.constant 0 : i32
    %c0_i32_1 = arith.constant 0 : i32
    return %c0_i32, %c0_i32_0 : i32, i32
  }
  func.func @transform_2(%arg0: i32) -> (i32, i32) {
    %c0_i32 = arith.constant 0 : i32
    %c0_i32_0 = arith.constant 0 : i32
    %c0_i32_1 = arith.constant 0 : i32
    return %c0_i32, %c0_i32_0 : i32, i32
  }
  func.func @transform_3(%arg0: i32) -> (i32, i32) {
    %c0_i32 = arith.constant 0 : i32
    %c0_i32_0 = arith.constant 0 : i32
    %c0_i32_1 = arith.constant 0 : i32
    return %c0_i32, %c0_i32_0 : i32, i32
  }
  func.func @transform_4(%arg0: i32) -> (i32, i32) {
    %c0_i32 = arith.constant 0 : i32
    %c0_i32_0 = arith.constant 0 : i32
    %c0_i32_1 = arith.constant 0 : i32
    return %c0_i32, %c0_i32_0 : i32, i32
  }
  func.func @transform_5(%arg0: i32) -> (i32, i32) {
    %c0_i32 = arith.constant 0 : i32
    %c0_i32_0 = arith.constant 0 : i32
    %c0_i32_1 = arith.constant 0 : i32
    return %c0_i32, %c0_i32_0 : i32, i32
  }
  func.func @transform_6(%arg0: i32) -> (i32, i32) {
    %c0_i32 = arith.constant 0 : i32
    %c0_i32_0 = arith.constant 0 : i32
    %c0_i32_1 = arith.constant 0 : i32
    return %c0_i32, %c0_i32_0 : i32, i32
  }
  func.func @transform_7(%arg0: i32) -> (i32, i32) {
    %c0_i32 = arith.constant 0 : i32
    %c0_i32_0 = arith.constant 0 : i32
    %c0_i32_1 = arith.constant 0 : i32
    return %c0_i32, %c0_i32_0 : i32, i32
  }
  func.func @transform_8(%arg0: i32) -> (i32, i32) {
    %c0_i32 = arith.constant 0 : i32
    %c0_i32_0 = arith.constant 0 : i32
    %c0_i32_1 = arith.constant 0 : i32
    return %c0_i32, %c0_i32_0 : i32, i32
  }
  func.func @transform_9(%arg0: i32) -> (i32, i32) {
    %c0_i32 = arith.constant 0 : i32
    %c0_i32_0 = arith.constant 0 : i32
    return %arg0, %c0_i32 : i32, i32
  }
  func.func @transform_10(%arg0: i32) -> (i32, i32) {
    %c0_i32 = arith.constant 0 : i32
    %c0_i32_0 = arith.constant 0 : i32
    return %arg0, %c0_i32 : i32, i32
  }
}

</mosaic_0001>

<bundles_post_ra>
// kernel: ae_forward.1
= control target key start
LH: loop header
LB: loop body
LE: loop exit
PB: predicated region body
PF: predicated region fallthrough
CT: control target
= control target key end

     0   :  { %vm2182_vm0 = vmmov 0   ;;  %s2805_s1 = inlined_call_operand.vmem [shape: bf16[1024,128], index: 1, kind: input, shape index: {}]   ;;  %s2806_s0 = inlined_call_operand.vmem [shape: bf16[16,1024], index: 0, kind: input, shape index: {}]   ;;  %s2807_s3 = inlined_call_operand.vmem [shape: bf16[128,128], index: 3, kind: input, shape index: {}]   ;;  %s2808_s5 = inlined_call_operand.vmem [shape: bf16[128,128], index: 5, kind: input, shape index: {}]   ;;  %s2809_s2 = inlined_call_operand.vmem [shape: f32[1,128], index: 2, kind: input, shape index: {}]   ;;  %s2810_s7 = inlined_call_operand.vmem [shape: bf16[128,1024], index: 7, kind: input, shape index: {}]   ;;  %s2811_s4 = inlined_call_operand.vmem [shape: f32[1,128], index: 4, kind: input, shape index: {}]   ;;  %s2812_s10 = inlined_call_operand.vmem [shape: f32[16,128], index: 10, kind: output, shape index: {1}]   ;;  %s2813_s6 = inlined_call_operand.vmem [shape: f32[1,128], index: 6, kind: input, shape index: {}]   ;;  %s2814_s8 = inlined_call_operand.vmem [shape: f32[1,1024], index: 8, kind: input, shape index: {}]   ;;  %s2815_s9 = inlined_call_operand.vmem [shape: f32[16,1024], index: 9, kind: output, shape index: {0}]  }
   0x1   :  { %v2037_v0 = vld [vmem:[%s2805_s1 + $0x78] sm:$0xff]   ;;  %v2041_v4 = vld [vmem:[%s2805_s1 + $0x70] sm:$0xff]   ;;  %v2045_v8 = vld [vmem:[%s2805_s1 + $0x68] sm:$0xff]  }
   0x2   :  { %v2038_v1 = vld [vmem:[%s2805_s1 + $0xf8] sm:$0xff]   ;;  %1888 = vmatprep.subr.bf16.mxu0 %v2037_v0  ;;  %v2042_v5 = vld [vmem:[%s2805_s1 + $0xf0] sm:$0xff]   ;;  %v2046_v9 = vld [vmem:[%s2805_s1 + $0xe8] sm:$0xff]  }
   0x3   :  { %v2039_v2 = vld [vmem:[%s2805_s1 + $0x38] sm:$0xff]   ;;  %1910 = vmatprep.subr.bf16.mxu1 %v2038_v1  ;;  %v2043_v6 = vld [vmem:[%s2805_s1 + $0x30] sm:$0xff]   ;;  %v2047_v10 = vld [vmem:[%s2805_s1 + $0x28] sm:$0xff]  }
   0x4   :  { %v2040_v3 = vld [vmem:[%s2805_s1 + $0xb8] sm:$0xff]   ;;  %1889 = vmatpush3.bf16.msra.mxu0 %v2039_v2  ;;  %v2044_v7 = vld [vmem:[%s2805_s1 + $0xb0] sm:$0xff]   ;;  %v2048_v11 = vld [vmem:[%s2805_s1 + $0xa8] sm:$0xff]  }
   0x5   :  { %1911 = vmatpush3.bf16.msra.mxu1 %v2040_v3  ;;  %1890 = vmatprep.subr.bf16.mxu0 %v2041_v4  ;;  %v2049_v12 = vld [vmem:[%s2805_s1 + $0x60] sm:$0xff]   ;;  %v2053_v16 = vld [vmem:[%s2805_s1 + $0x58] sm:$0xff]   ;;  %v2057_v20 = vld [vmem:[%s2805_s1 + $0x50] sm:$0xff]  }
   0x6   :  { %1912 = vmatprep.subr.bf16.mxu1 %v2042_v5  ;;  %v2050_v13 = vld [vmem:[%s2805_s1 + $0xe0] sm:$0xff]   ;;  %v2054_v17 = vld [vmem:[%s2805_s1 + $0xd8] sm:$0xff]   ;;  %v2058_v21 = vld [vmem:[%s2805_s1 + $0xd0] sm:$0xff]  }
   0x7   :  { %v2051_v14 = vld [vmem:[%s2805_s1 + $0x20] sm:$0xff]   ;;  %v2055_v18 = vld [vmem:[%s2805_s1 + $0x18] sm:$0xff]   ;;  %v2059_v22 = vld [vmem:[%s2805_s1 + $0x10] sm:$0xff]  }
   0x8   :  { %1891 = vmatpush3.bf16.msra.mxu0 %v2043_v6  ;;  %v2052_v15 = vld [vmem:[%s2805_s1 + $0xa0] sm:$0xff]   ;;  %v2056_v19 = vld [vmem:[%s2805_s1 + $0x98] sm:$0xff]   ;;  %v2060_v23 = vld [vmem:[%s2805_s1 + $0x90] sm:$0xff]  }
   0x9   :  { %1913 = vmatpush3.bf16.msra.mxu1 %v2044_v7  ;;  %1892 = vmatprep.subr.bf16.mxu0 %v2045_v8  ;;  %v2061_v24 = vld [vmem:[%s2805_s1 + $0x48] sm:$0xff]   ;;  %v2065_v28 = vld [vmem:[%s2805_s1 + $0x40] sm:$0xff]   ;;  %v2069_v40 = vld [vmem:[%s2805_s1 + $0x178] sm:$0xff]  }
   0xa   :  { %1914 = vmatprep.subr.bf16.mxu1 %v2046_v9  ;;  %v2062_v25 = vld [vmem:[%s2805_s1 + $0xc8] sm:$0xff]   ;;  %v2066_v29 = vld [vmem:[%s2805_s1 + $0xc0] sm:$0xff]   ;;  %v2070_v41 = vld [vmem:[%s2805_s1 + $0x1f8] sm:$0xff]  }
   0xb   :  { %v2063_v26 = vld [vmem:[%s2805_s1 + $0x8] sm:$0xff]   ;;  %v2067_v30 = vld [vmem:[%s2805_s1] sm:$0xff]   ;;  %v2071_v42 = vld [vmem:[%s2805_s1 + $0x138] sm:$0xff]  }
   0xc   :  { %1893 = vmatpush3.bf16.msra.mxu0 %v2047_v10  ;;  %v2064_v27 = vld [vmem:[%s2805_s1 + $0x88] sm:$0xff]   ;;  %v2068_v31 = vld [vmem:[%s2805_s1 + $0x80] sm:$0xff]   ;;  %v2072_v43 = vld [vmem:[%s2805_s1 + $0x1b8] sm:$0xff]  }
   0xd   :  { %1915 = vmatpush3.bf16.msra.mxu1 %v2048_v11  ;;  %1894 = vmatprep.subr.bf16.mxu0 %v2049_v12  ;;  %v35_v32 = vld [vmem:[%s2806_s0] sm:$0xff]  ;;  %v36_v34 = vld [vmem:[%s2806_s0 + $0x8] sm:$0xff]  ;;  %v2073_v44 = vld [vmem:[%s2805_s1 + $0x170] sm:$0xff]  }
   0xe   :  { %1916 = vmatprep.subr.bf16.mxu1 %v2050_v13  ;;  %v39_v33 = vld [vmem:[%s2806_s0 + $0x20] sm:$0xff]  ;;  %v40_v37 = vld [vmem:[%s2806_s0 + $0x28] sm:$0xff]  ;;  %v2074_v45 = vld [vmem:[%s2805_s1 + $0x1f0] sm:$0xff]  }
   0xf   :  { %v1718_v35 = vcombine.low %v35_v32, %v39_v33  ;;  %v1719_v36 = vcombine.high %v35_v32, %v39_v33  ;;  %v1720_v38 = vcombine.low %v36_v34, %v40_v37  ;;  %v1721_v39 = vcombine.high %v36_v34, %v40_v37  ;;  %v2075_v46 = vld [vmem:[%s2805_s1 + $0x130] sm:$0xff]   ;;  %v2077_v48 = vld [vmem:[%s2805_s1 + $0x168] sm:$0xff]   ;;  %v2081_v52 = vld [vmem:[%s2805_s1 + $0x160] sm:$0xff]  }
  0x10   :  { %1895 = vmatpush3.bf16.msra.mxu0 %v2051_v14  ;;  %v2076_v47 = vld [vmem:[%s2805_s1 + $0x1b0] sm:$0xff]   ;;  %v2078_v49 = vld [vmem:[%s2805_s1 + $0x1e8] sm:$0xff]   ;;  %v2082_v53 = vld [vmem:[%s2805_s1 + $0x1e0] sm:$0xff]  }
  0x11   :  { %1917 = vmatpush3.bf16.msra.mxu1 %v2052_v15  ;;  %1896 = vmatprep.subr.bf16.mxu0 %v2053_v16  ;;  %v2079_v50 = vld [vmem:[%s2805_s1 + $0x128] sm:$0xff]   ;;  %v2083_v54 = vld [vmem:[%s2805_s1 + $0x120] sm:$0xff]   ;;  %v2085_v56 = vld [vmem:[%s2805_s1 + $0x158] sm:$0xff]   ;;  %v2181_v16 = vmov 0.0  }
  0x12   :  { %1918 = vmatprep.subr.bf16.mxu1 %v2054_v17  ;;  %634 = vmatprep.mubr.bf16.mxu0 %v1719_v36  ;;  %v2080_v51 = vld [vmem:[%s2805_s1 + $0x1a8] sm:$0xff]   ;;  %v2084_v55 = vld [vmem:[%s2805_s1 + $0x1a0] sm:$0xff]   ;;  %v2086_v57 = vld [vmem:[%s2805_s1 + $0x1d8] sm:$0xff]  }
  0x13   :  { %675 = vmatprep.mubr.bf16.mxu1 %v1721_v39  ;;  %v2087_v58 = vld [vmem:[%s2805_s1 + $0x118] sm:$0xff]   ;;  %v2089_v60 = vld [vmem:[%s2805_s1 + $0x150] sm:$0xff]   ;;  %v2093_v0 = vld [vmem:[%s2805_s1 + $0x148] sm:$0xff]  }
  0x14   :  { %1897 = vmatpush3.bf16.msra.mxu0 %v2055_v18  ;;  %v2088_v59 = vld [vmem:[%s2805_s1 + $0x198] sm:$0xff]   ;;  %v2090_v61 = vld [vmem:[%s2805_s1 + $0x1d0] sm:$0xff]   ;;  %v2094_v1 = vld [vmem:[%s2805_s1 + $0x1c8] sm:$0xff]  }
  0x15   :  { %1919 = vmatpush3.bf16.msra.mxu1 %v2056_v19  ;;  %1898 = vmatprep.subr.bf16.mxu0 %v2057_v20  ;;  %v2091_v62 = vld [vmem:[%s2805_s1 + $0x110] sm:$0xff]   ;;  %v2095_v2 = vld [vmem:[%s2805_s1 + $0x108] sm:$0xff]   ;;  %v2097_v4 = vld [vmem:[%s2805_s1 + $0x140] sm:$0xff]  }
  0x16   :  { %1920 = vmatprep.subr.bf16.mxu1 %v2058_v21  ;;  %v2092_v63 = vld [vmem:[%s2805_s1 + $0x190] sm:$0xff]   ;;  %v2096_v3 = vld [vmem:[%s2805_s1 + $0x188] sm:$0xff]   ;;  %v2098_v5 = vld [vmem:[%s2805_s1 + $0x1c0] sm:$0xff]  }
  0x17   :  { %v2099_v6 = vld [vmem:[%s2805_s1 + $0x100] sm:$0xff]   ;;  %v37_v8 = vld [vmem:[%s2806_s0 + $0x10] sm:$0xff]  ;;  %v38_v12 = vld [vmem:[%s2806_s0 + $0x18] sm:$0xff] }
  0x18   :  { %1899 = vmatpush3.bf16.msra.mxu0 %v2059_v22  ;;  %v2100_v7 = vld [vmem:[%s2805_s1 + $0x180] sm:$0xff]   ;;  %v41_v9 = vld [vmem:[%s2806_s0 + $0x30] sm:$0xff]  ;;  %v42_v13 = vld [vmem:[%s2806_s0 + $0x38] sm:$0xff] }
  0x19   :  { %1921 = vmatpush3.bf16.msra.mxu1 %v2060_v23  ;;  %1900 = vmatprep.subr.bf16.mxu0 %v2061_v24  ;;  %v1722_v10 = vcombine.low %v37_v8, %v41_v9  ;;  %v1723_v11 = vcombine.high %v37_v8, %v41_v9  ;;  %v1724_v14 = vcombine.low %v38_v12, %v42_v13  ;;  %v2101_v17 = vld [vmem:[%s2807_s3 + $0x38] sm:$0xff]   ;;  %v2102_v18 = vld [vmem:[%s2807_s3 + $0x30] sm:$0xff]   ;;  %v2103_v19 = vld [vmem:[%s2807_s3 + $0x28] sm:$0xff]  }
  0x1a   :  { %1922 = vmatprep.subr.bf16.mxu1 %v2062_v25  ;;  %v1725_v15 = vcombine.high %v38_v12, %v42_v13  ;;  %v2104_v20 = vld [vmem:[%s2807_s3 + $0x20] sm:$0xff]   ;;  %v2105_v21 = vld [vmem:[%s2807_s3 + $0x18] sm:$0xff]   ;;  %v2106_v22 = vld [vmem:[%s2807_s3 + $0x10] sm:$0xff]  }
  0x1b   :  { %v2107_v23 = vld [vmem:[%s2807_s3 + $0x8] sm:$0xff]   ;;  %v2108_v24 = vld [vmem:[%s2807_s3] sm:$0xff]   ;;  %v2109_v25 = vld [vmem:[%s2808_s5 + $0x38] sm:$0xff]  }
  0x1c   :  { %1901 = vmatpush3.bf16.msra.mxu0 %v2063_v26  ;;  %v2110_v26 = vld [vmem:[%s2808_s5 + $0x30] sm:$0xff]   ;;  %v1051_v12 = vld [vmem:[%s2810_s7 + $0x1a0] sm:$0xff] }
  0x1d   :  { %1923 = vmatpush3.bf16.msra.mxu1 %v2064_v27  ;;  %1902 = vmatprep.subr.bf16.mxu0 %v2065_v28  ;;  %v2111_v27 = vld [vmem:[%s2808_s5 + $0x28] sm:$0xff]   ;;  %v2112_v28 = vld [vmem:[%s2808_s5 + $0x20] sm:$0xff]  }
  0x1e   :  { %1924 = vmatprep.subr.bf16.mxu1 %v2066_v29  ;;  %v2113_v29 = vld [vmem:[%s2808_s5 + $0x18] sm:$0xff]  }
  0x20   :  { %1903 = vmatpush3.bf16.msra.mxu0 %v2067_v30  ;;  %v2114_v30 = vld [vmem:[%s2808_s5 + $0x10] sm:$0xff]  }
  0x21   :  { %1925 = vmatpush3.bf16.msra.mxu1 %v2068_v31  ;;  %1932 = vmatprep.subr.bf16.mxu0 %v2069_v40 }
  0x22   :  { %1954 = vmatprep.subr.bf16.mxu1 %v2070_v41 }
  0x23   :  { %635 = vmatmul.mubr.bf16.vlgmr.msra.gmra.mxu0 %v1718_v35 }
  0x24   :  { %676 = vmatmul.mubr.bf16.vlgmr.msra.gmra.mxu1 %v1720_v38  ;;  %1933 = vmatpush3.bf16.msra.mxu0 %v2071_v42  ;;  %v1717_v38 = vld [vmem:[%s2809_s2] ss:$0 sm:$0xff] }
  0x25   :  { %1955 = vmatpush3.bf16.msra.mxu1 %v2072_v43  ;;  %1934 = vmatprep.subr.bf16.mxu0 %v2073_v44 }
  0x26   :  { %1956 = vmatprep.subr.bf16.mxu1 %v2074_v45  ;;  %716 = vmatprep.mubr.bf16.mxu0 %v1723_v11  ;;  %v1047_v11 = vld [vmem:[%s2810_s7 + $0x180] sm:$0xff] }
  0x27   :  { %757 = vmatprep.mubr.bf16.mxu1 %v1725_v15  ;;  %v1857_v15 = vcombine.high %v1047_v11, %v1051_v12 }
  0x28   :  { %1935 = vmatpush3.bf16.msra.mxu0 %v2075_v46 }
  0x29   :  { %1957 = vmatpush3.bf16.msra.mxu1 %v2076_v47  ;;  %1936 = vmatprep.subr.bf16.mxu0 %v2077_v48 }
  0x2a   :  { %1958 = vmatprep.subr.bf16.mxu1 %v2078_v49 }
  0x2c   :  { %1937 = vmatpush3.bf16.msra.mxu0 %v2079_v50 }
  0x2d   :  { %1959 = vmatpush3.bf16.msra.mxu1 %v2080_v51  ;;  %1938 = vmatprep.subr.bf16.mxu0 %v2081_v52 }
  0x2e   :  { %1960 = vmatprep.subr.bf16.mxu1 %v2082_v53 }
  0x30   :  { %1939 = vmatpush3.bf16.msra.mxu0 %v2083_v54 }
  0x31   :  { %1961 = vmatpush3.bf16.msra.mxu1 %v2084_v55  ;;  %1940 = vmatprep.subr.bf16.mxu0 %v2085_v56 }
  0x32   :  { %1962 = vmatprep.subr.bf16.mxu1 %v2086_v57 }
  0x34   :  { %1941 = vmatpush3.bf16.msra.mxu0 %v2087_v58 }
  0x35   :  { %1963 = vmatpush3.bf16.msra.mxu1 %v2088_v59  ;;  %1942 = vmatprep.subr.bf16.mxu0 %v2089_v60 }
  0x36   :  { %1964 = vmatprep.subr.bf16.mxu1 %v2090_v61 }
  0x38   :  { %1943 = vmatpush3.bf16.msra.mxu0 %v2091_v62 }
  0x39   :  { %1965 = vmatpush3.bf16.msra.mxu1 %v2092_v63  ;;  %1944 = vmatprep.subr.bf16.mxu0 %v2093_v0 }
  0x3a   :  { %1966 = vmatprep.subr.bf16.mxu1 %v2094_v1 }
  0x3c   :  { %1945 = vmatpush3.bf16.msra.mxu0 %v2095_v2 }
  0x3d   :  { %1967 = vmatpush3.bf16.msra.mxu1 %v2096_v3  ;;  %1946 = vmatprep.subr.bf16.mxu0 %v2097_v4  ;;  %v2115_v3 = vld [vmem:[%s2808_s5 + $0x8] sm:$0xff]   ;;  %v2116_v4 = vld [vmem:[%s2808_s5] sm:$0xff]  }
  0x3e   :  { %1968 = vmatprep.subr.bf16.mxu1 %v2098_v5  ;;  %v1055_v5 = vld [vmem:[%s2810_s7 + $0x1c0] sm:$0xff] }
  0x40   :  { %1947 = vmatpush3.bf16.msra.mxu0 %v2099_v6  ;;  %v1059_v6 = vld [vmem:[%s2810_s7 + $0x1e0] sm:$0xff] }
  0x41   :  { %1969 = vmatpush3.bf16.msra.mxu1 %v2100_v7  ;;  %1994 = vmatprep.subr.bf16.mxu0 %v2181_v16  ;;  %v1056_v7 = vld [vmem:[%s2810_s7 + $0x1c8] sm:$0xff]  ;;  %v1864_v8 = vcombine.low %v1055_v5, %v1059_v6  ;;  %v1865_v9 = vcombine.high %v1055_v5, %v1059_v6  ;;  %v999_v5 = vld [vmem:[%s2810_s7] sm:$0xff] }
  0x42   :  { %2014 = vmatprep.subr.bf16.mxu1 %v2181_v16  ;;  %v1003_v6 = vld [vmem:[%s2810_s7 + $0x20] sm:$0xff] }
  0x43   :  { %717 = vmatmul.mubr.bf16.vlgmr.msra.gmra.mxu0 %v1722_v10  ;;  %v1060_v10 = vld [vmem:[%s2810_s7 + $0x1e8] sm:$0xff] }
  0x44   :  { %758 = vmatmul.mubr.bf16.vlgmr.msra.gmra.mxu1 %v1724_v14  ;;  %1995 = vmatpush3.bf16.msra.mxu0 %v2101_v17  ;;  %v1866_v13 = vcombine.low %v1056_v7, %v1060_v10  ;;  %v1867_v14 = vcombine.high %v1056_v7, %v1060_v10  ;;  %v1039_v17 = vld [vmem:[%s2810_s7 + $0x140] sm:$0xff]  ;;  %v1000_v7 = vld [vmem:[%s2810_s7 + $0x8] sm:$0xff]  ;;  %v1808_v10 = vcombine.low %v999_v5, %v1003_v6 }
  0x45   :  { %1996 = vmatprep.subr.bf16.mxu0 %v2181_v16  ;;  %2010 = vmatprep.mubr.msk.bf16.mxu0 %vm2182_vm0, %v2181_v16 }
  0x46   :  { %2030 = vmatprep.mubr.msk.bf16.mxu1 %vm2182_vm0, %v2181_v16  ;;  %2015 = vmatpush3.bf16.msra.mxu1 %v2109_v25  ;;  %v1023_v25 = vld [vmem:[%s2810_s7 + $0xc0] sm:$0xff] }
  0x47   :  { %2016 = vmatprep.subr.bf16.mxu1 %v2181_v16 }
  0x48   :  { %1997 = vmatpush3.bf16.msra.mxu0 %v2102_v18  ;;  %v1043_v18 = vld [vmem:[%s2810_s7 + $0x160] sm:$0xff] }
  0x49   :  { %1998 = vmatprep.subr.bf16.mxu0 %v2181_v16 }
  0x4a   :  { %2017 = vmatpush3.bf16.msra.mxu1 %v2110_v26  ;;  %v1027_v26 = vld [vmem:[%s2810_s7 + $0xe0] sm:$0xff] }
  0x4b   :  { %2018 = vmatprep.subr.bf16.mxu1 %v2181_v16 }
  0x4c   :  { %1999 = vmatpush3.bf16.msra.mxu0 %v2103_v19  ;;  %v1849_v19 = vcombine.high %v1039_v17, %v1043_v18 }
  0x4d   :  { %2000 = vmatprep.subr.bf16.mxu0 %v2181_v16 }
  0x4e   :  { %2019 = vmatpush3.bf16.msra.mxu1 %v2111_v27  ;;  %v1833_v27 = vcombine.high %v1023_v25, %v1027_v26 }
  0x4f   :  { %2020 = vmatprep.subr.bf16.mxu1 %v2181_v16 }
  0x50   :  { %2001 = vmatpush3.bf16.msra.mxu0 %v2104_v20  ;;  %v1848_v20 = vcombine.low %v1039_v17, %v1043_v18  ;;  %v1062_v18 = vld [vmem:[%s2810_s7 + $0x1f8] sm:$0xff] }
  0x51   :  { %2002 = vmatprep.subr.bf16.mxu0 %v2181_v16 }
  0x52   :  { %2021 = vmatpush3.bf16.msra.mxu1 %v2112_v28  ;;  %v1832_v28 = vcombine.low %v1023_v25, %v1027_v26 }
  0x53   :  { %2022 = vmatprep.subr.bf16.mxu1 %v2181_v16 }
  0x54   :  { %2003 = vmatpush3.bf16.msra.mxu0 %v2105_v21  ;;  %v1031_v21 = vld [vmem:[%s2810_s7 + $0x100] sm:$0xff] }
  0x55   :  { %2004 = vmatprep.subr.bf16.mxu0 %v2181_v16 }
  0x56   :  { %2023 = vmatpush3.bf16.msra.mxu1 %v2113_v29  ;;  %v1015_v29 = vld [vmem:[%s2810_s7 + $0x80] sm:$0xff] }
  0x57   :  { %2024 = vmatprep.subr.bf16.mxu1 %v2181_v16 }
  0x58   :  { %2005 = vmatpush3.bf16.msra.mxu0 %v2106_v22  ;;  %v1035_v22 = vld [vmem:[%s2810_s7 + $0x120] sm:$0xff] }
  0x59   :  { %2006 = vmatprep.subr.bf16.mxu0 %v2181_v16 }
  0x5a   :  { %2025 = vmatpush3.bf16.msra.mxu1 %v2114_v30  ;;  %v1019_v30 = vld [vmem:[%s2810_s7 + $0xa0] sm:$0xff] }
  0x5b   :  { %2026 = vmatprep.subr.bf16.mxu1 %v2181_v16 }
  0x5c   :  { %2007 = vmatpush3.bf16.msra.mxu0 %v2107_v23  ;;  %v1841_v23 = vcombine.high %v1031_v21, %v1035_v22 }
  0x5d   :  { %2008 = vmatprep.subr.bf16.mxu0 %v2181_v16 }
  0x5e   :  { %2027 = vmatpush3.bf16.msra.mxu1 %v2115_v3 }
  0x5f   :  { %2028 = vmatprep.subr.bf16.mxu1 %v2181_v16  ;;  %v1856_v16 = vcombine.low %v1047_v11, %v1051_v12 }
  0x60   :  { %2009 = vmatpush3.bf16.msra.mxu0 %v2108_v24  ;;  %v1840_v24 = vcombine.low %v1031_v21, %v1035_v22  ;;  %v1799_v22 = vld [vmem:[%s2813_s6] ss:$0 sm:$0xff] }
  0x61   :  { %1425 = vmatprep.subr.bf16.mxu0 %v1865_v9  ;;  %v1004_v9 = vld [vmem:[%s2810_s7 + $0x28] sm:$0xff] }
  0x62   :  { %2029 = vmatpush3.bf16.msra.mxu1 %v2116_v4  ;;  %v1810_v11 = vcombine.low %v1000_v7, %v1004_v9  ;;  %v1811_v12 = vcombine.high %v1000_v7, %v1004_v9  ;;  %v1013_v7 = vld [vmem:[%s2810_s7 + $0x70] sm:$0xff]  ;;  %v1014_v9 = vld [vmem:[%s2810_s7 + $0x78] sm:$0xff] }
  0x63   :  { %1468 = vmatprep.subr.bf16.mxu1 %v1867_v14  ;;  %v1061_v14 = vld [vmem:[%s2810_s7 + $0x1f0] sm:$0xff] }
  0xe3   :  { %v1904_v31 = vpop.f32.mrf.mxu0 }
  0xe4   :  { %v1926_v32 = vpop.f32.mrf.mxu1 }
  0xe5   :  { %v1905_v33 = vpop.f32.mrf.mxu0 }
  0xe6   :  { %v1927_v34 = vpop.f32.mrf.mxu1  ;;  %v1906_v36 = vadd.f32 %v1905_v33, %v1904_v31  ;;  %v1825_v31 = vcombine.high %v1015_v29, %v1019_v30  ;;  %v1790_v33 = vld [vmem:[%s2811_s4] ss:$0 sm:$0xff] }
  0xe7   :  { %v1907_v35 = vpop.f32.mrf.mxu0  ;;  %v1928_v41 = vadd.f32 %v1927_v34, %v1926_v32  ;;  %v1824_v32 = vcombine.low %v1015_v29, %v1019_v30  ;;  %v1053_v30 = vld [vmem:[%s2810_s7 + $0x1b0] sm:$0xff] }
  0xe8   :  { %v1929_v37 = vpop.f32.mrf.mxu1  ;;  %v637_v40 = vadd.f32 %v1906_v36, %v1717_v38 }
  0xe9   :  { %v1908_v39 = vpop.f32.mrf.mxu0 }
  0xea   :  { %v1909_v42 = vadd.f32 %v1908_v39, %v1907_v35  ;;  %v1930_v43 = vpop.f32.mrf.mxu1  ;;  %v678_v47 = vadd.f32 %v1928_v41, %v637_v40  ;;  %v1052_v39 = vld [vmem:[%s2810_s7 + $0x1a8] sm:$0xff] }
  0xeb   :  { %v1931_v52 = vadd.f32 %v1930_v43, %v1929_v37 }
  0xec   :  { %v640_v48 = vadd.f32 %v1909_v42, %v1717_v38  ;;  %v1048_v38 = vld [vmem:[%s2810_s7 + $0x188] sm:$0xff] }
  0xed   :  { %v1859_v43 = vcombine.high %v1048_v38, %v1052_v39 }
  0xee   :  { %v681_v56 = vadd.f32 %v1931_v52, %v640_v48  ;;  %v1032_v48 = vld [vmem:[%s2810_s7 + $0x108] sm:$0xff] }
  0xef   :  { %v1024_v52 = vld [vmem:[%s2810_s7 + $0xc8] sm:$0xff] }
 0x103   :  { %v1948_v44 = vpop.f32.mrf.mxu0 }
 0x104   :  { %v1970_v45 = vpop.f32.mrf.mxu1 }
 0x105   :  { %v1949_v46 = vpop.f32.mrf.mxu0 }
 0x106   :  { %v1950_v49 = vadd.f32 %v1949_v46, %v1948_v44  ;;  %v1971_v50 = vpop.f32.mrf.mxu1  ;;  %v1040_v44 = vld [vmem:[%s2810_s7 + $0x148] sm:$0xff]  ;;  %v1858_v46 = vcombine.low %v1048_v38, %v1052_v39  ;;  %v1041_v38 = vld [vmem:[%s2810_s7 + $0x150] sm:$0xff] }
 0x107   :  { %v1951_v51 = vpop.f32.mrf.mxu0  ;;  %v1972_v57 = vadd.f32 %v1971_v50, %v1970_v45  ;;  %v1044_v45 = vld [vmem:[%s2810_s7 + $0x168] sm:$0xff]  ;;  %v1045_v39 = vld [vmem:[%s2810_s7 + $0x170] sm:$0xff] }
 0x108   :  { %v719_v53 = vadd.f32 %v1950_v49, %v678_v47  ;;  %v1973_v54 = vpop.f32.mrf.mxu1  ;;  %v1851_v47 = vcombine.high %v1040_v44, %v1044_v45  ;;  %v1036_v49 = vld [vmem:[%s2810_s7 + $0x128] sm:$0xff]  ;;  %v1850_v50 = vcombine.low %v1040_v44, %v1044_v45  ;;  %v1853_v44 = vcombine.high %v1041_v38, %v1045_v39 }
 0x109   :  { %v1952_v55 = vpop.f32.mrf.mxu0 }
 0x10a   :  { %v1953_v58 = vadd.f32 %v1952_v55, %v1951_v51  ;;  %v1974_v59 = vpop.f32.mrf.mxu1  ;;  %v760_v60 = vadd.f32 %v1972_v57, %v719_v53  ;;  %v1843_v51 = vcombine.high %v1032_v48, %v1036_v49  ;;  %v1028_v53 = vld [vmem:[%s2810_s7 + $0xe8] sm:$0xff] }
 0x10b   :  { %v1975_v62 = vadd.f32 %v1974_v59, %v1973_v54  ;;  %v1842_v54 = vcombine.low %v1032_v48, %v1036_v49  ;;  %v1835_v55 = vcombine.high %v1024_v52, %v1028_v53  ;;  %v1020_v57 = vld [vmem:[%s2810_s7 + $0xa8] sm:$0xff]  ;;  %v1034_v48 = vld [vmem:[%s2810_s7 + $0x118] sm:$0xff] }
 0x10c   :  { %v722_v61 = vadd.f32 %v1953_v58, %v681_v56  ;;  %v766_v0 = vmax.f32 %v760_v60, 0.0  ;;  %v1016_v56 = vld [vmem:[%s2810_s7 + $0x88] sm:$0xff]  ;;  %v1834_v58 = vcombine.low %v1024_v52, %v1028_v53  ;;  %v1038_v49 = vld [vmem:[%s2810_s7 + $0x138] sm:$0xff] }
 0x10d   :  { %v1827_v59 = vcombine.high %v1016_v56, %v1020_v57  ;;  %v1826_v60 = vcombine.low %v1016_v56, %v1020_v57  ;;  %v1847_v53 = vcombine.high %v1034_v48, %v1038_v49  ;;  %v1026_v56 = vld [vmem:[%s2810_s7 + $0xd8] sm:$0xff] }
 0x10e   :  { %v763_v63 = vadd.f32 %v1975_v62, %v722_v61  ;;  %v1007_v61 = vld [vmem:[%s2810_s7 + $0x40] sm:$0xff]  ;;  %v1030_v57 = vld [vmem:[%s2810_s7 + $0xf8] sm:$0xff] }
 0x10f   :  { %v1011_v62 = vld [vmem:[%s2810_s7 + $0x60] sm:$0xff] }
 0x110   :  { %v767_v1 = vmax.f32 %v763_v63, 0.0  ;;  %v1008_v63 = vld [vmem:[%s2810_s7 + $0x48] sm:$0xff] }
 0x112   :  { %v768_v2 = vpack.c.bf16 %v767_v1, %v766_v0  ;;  %v1817_v0 = vcombine.high %v1007_v61, %v1011_v62  ;;  %v1012_v1 = vld [vmem:[%s2810_s7 + $0x68] sm:$0xff] }
 0x113   :  { %v1818_v3 = vcombine.low %v1008_v63, %v1012_v1  ;;  %v1819_v4 = vcombine.high %v1008_v63, %v1012_v1  ;;  %v1021_v63 = vld [vmem:[%s2810_s7 + $0xb0] sm:$0xff]  ;;  %v1022_v1 = vld [vmem:[%s2810_s7 + $0xb8] sm:$0xff] }
 0x114   :  { %2011 = vmatmul.mubr.bf16.vlgmr.msra.gmra.mxu0 %v768_v2  ;;  %v1816_v2 = vcombine.low %v1007_v61, %v1011_v62  ;;  %v1839_v61 = vcombine.high %v1026_v56, %v1030_v57  ;;  %v1017_v62 = vld [vmem:[%s2810_s7 + $0x90] sm:$0xff] }
 0x115   :  { %1426 = vmatpush1.bf16.msra.mxu0 %v1864_v8  ;;  %v1809_v8 = vcombine.high %v999_v5, %v1003_v6  ;;  %v1009_v6 = vld [vmem:[%s2810_s7 + $0x50] sm:$0xff] }
 0x116   :  { %1427 = vmatprep.subr.bf16.mxu0 %v1857_v15  ;;  %v1058_v15 = vld [vmem:[%s2810_s7 + $0x1d8] sm:$0xff] }
 0x117   :  { %v1871_v21 = vcombine.high %v1058_v15, %v1062_v18 }
 0x119   :  { %1428 = vmatpush1.bf16.msra.mxu0 %v1856_v16 }
 0x11a   :  { %1429 = vmatprep.subr.bf16.mxu0 %v1849_v19  ;;  %v2183_v19 = vmov 0  }
 0x11b   :  { %1457 = vmatprep.mubr.bf16.mxu0 %v2183_v19 }
 0x11d   :  { %1430 = vmatpush1.bf16.msra.mxu0 %v1848_v20  ;;  %v1870_v20 = vcombine.low %v1058_v15, %v1062_v18  ;;  %v1005_v15 = vld [vmem:[%s2810_s7 + $0x30] sm:$0xff]  ;;  %v1820_v18 = vcombine.low %v1009_v6, %v1013_v7 }
 0x11e   :  { %1431 = vmatprep.subr.bf16.mxu0 %v1841_v23 }
 0x121   :  { %1432 = vmatpush1.bf16.msra.mxu0 %v1840_v24 }
 0x122   :  { %1433 = vmatprep.subr.bf16.mxu0 %v1833_v27 }
 0x125   :  { %1434 = vmatpush1.bf16.msra.mxu0 %v1832_v28  ;;  %v1049_v28 = vld [vmem:[%s2810_s7 + $0x190] sm:$0xff] }
 0x126   :  { %1435 = vmatprep.subr.bf16.mxu0 %v1825_v31  ;;  %v1050_v31 = vld [vmem:[%s2810_s7 + $0x198] sm:$0xff] }
 0x129   :  { %1436 = vmatpush1.bf16.msra.mxu0 %v1824_v32  ;;  %v1054_v32 = vld [vmem:[%s2810_s7 + $0x1b8] sm:$0xff] }
 0x12a   :  { %1437 = vmatprep.subr.bf16.mxu0 %v1817_v0  ;;  %v1018_v0 = vld [vmem:[%s2810_s7 + $0x98] sm:$0xff] }
 0x12b   :  { %v1831_v5 = vcombine.high %v1018_v0, %v1022_v1 }
 0x12d   :  { %1438 = vmatpush1.bf16.msra.mxu0 %v1816_v2 }
 0x12e   :  { %1439 = vmatprep.subr.bf16.mxu0 %v1809_v8  ;;  %v1010_v8 = vld [vmem:[%s2810_s7 + $0x58] sm:$0xff] }
 0x131   :  { %1440 = vmatpush1.bf16.msra.mxu0 %v1808_v10  ;;  %v1828_v10 = vcombine.low %v1017_v62, %v1021_v63 }
 0x1d4   :  { %v874_v34 = vpop.f32.mrf.mxu0 }
 0x1d5   :  { %v875_v35 = vadd.f32 %v1790_v33, %v874_v34 }
 0x1d6   :  { %v2012_v36 = vpop.f32.mrf.mxu0 }
 0x1d7   :  { %881 = vst [vmem:[%s2812_s10] sm:$0xff] %v875_v35  ;;  %v1861_v36 = vcombine.high %v1049_v28, %v1053_v30 }
 0x1d8   :  { %v877_v37 = vpop.f32.mrf.mxu0 }
 0x1d9   :  { %v878_v40 = vadd.f32 %v1790_v33, %v877_v37  ;;  %v1863_v37 = vcombine.high %v1050_v31, %v1054_v32 }
 0x1da   :  { %v2013_v41 = vpop.f32.mrf.mxu0 }
 0x1db   :  { %882 = vst [vmem:[%s2812_s10 + $0x8] sm:$0xff] %v878_v40  ;;  %v883_v42 = vpack.c.bf16 %v878_v40, %v875_v35  ;;  %v1042_v40 = vld [vmem:[%s2810_s7 + $0x158] sm:$0xff] }
 0x1dc   :  { %v1046_v41 = vld [vmem:[%s2810_s7 + $0x178] sm:$0xff] }
 0x1dd   :  { %2031 = vmatmul.mubr.bf16.vlgmr.msra.gmra.mxu1 %v883_v42  ;;  %v1860_v42 = vcombine.low %v1049_v28, %v1053_v30  ;;  %v1855_v45 = vcombine.high %v1042_v40, %v1046_v41  ;;  %v2741_v28 = vld [vmem:[%s2814_s8] sm:$0xff] }
 0x1de   :  { %1469 = vmatpush1.bf16.msra.mxu1 %v1866_v13  ;;  %v1057_v13 = vld [vmem:[%s2810_s7 + $0x1d0] sm:$0xff]  ;;  %1500 = vmatprep.mubr.bf16.mxu1 %v2183_v19 }
 0x1df   :  { %1470 = vmatprep.subr.bf16.mxu1 %v1859_v43  ;;  %v1868_v16 = vcombine.low %v1057_v13, %v1061_v14  ;;  %v1869_v17 = vcombine.high %v1057_v13, %v1061_v14  ;;  %v1862_v43 = vcombine.low %v1050_v31, %v1054_v32  ;;  %v1823_v13 = vcombine.high %v1010_v8, %v1014_v9  ;;  %v1001_v14 = vld [vmem:[%s2810_s7 + $0x10] sm:$0xff] }
 0x1e1   :  { %1511 = vmatprep.subr.bf16.mxu0 %v1869_v17  ;;  %v1006_v17 = vld [vmem:[%s2810_s7 + $0x38] sm:$0xff] }
 0x1e2   :  { %1471 = vmatpush1.bf16.msra.mxu1 %v1858_v46  ;;  %v1033_v46 = vld [vmem:[%s2810_s7 + $0x110] sm:$0xff] }
 0x1e3   :  { %1472 = vmatprep.subr.bf16.mxu1 %v1851_v47  ;;  %v1037_v47 = vld [vmem:[%s2810_s7 + $0x130] sm:$0xff] }
 0x1e4   :  { %v1845_v52 = vcombine.high %v1033_v46, %v1037_v47 }
 0x1e6   :  { %1473 = vmatpush1.bf16.msra.mxu1 %v1850_v50  ;;  %v1852_v50 = vcombine.low %v1041_v38, %v1045_v39 }
 0x1e7   :  { %1474 = vmatprep.subr.bf16.mxu1 %v1843_v51  ;;  %v1854_v51 = vcombine.low %v1042_v40, %v1046_v41 }
 0x1ea   :  { %1475 = vmatpush1.bf16.msra.mxu1 %v1842_v54  ;;  %v1025_v54 = vld [vmem:[%s2810_s7 + $0xd0] sm:$0xff] }
 0x1eb   :  { %1476 = vmatprep.subr.bf16.mxu1 %v1835_v55  ;;  %v1029_v55 = vld [vmem:[%s2810_s7 + $0xf0] sm:$0xff] }
 0x1ec   :  { %v1836_v2 = vcombine.low %v1025_v54, %v1029_v55 }
 0x1ee   :  { %1477 = vmatpush1.bf16.msra.mxu1 %v1834_v58  ;;  %v1844_v58 = vcombine.low %v1033_v46, %v1037_v47 }
 0x1ef   :  { %1478 = vmatprep.subr.bf16.mxu1 %v1827_v59  ;;  %v1846_v59 = vcombine.low %v1034_v48, %v1038_v49 }
 0x1f2   :  { %1479 = vmatpush1.bf16.msra.mxu1 %v1826_v60  ;;  %v1837_v60 = vcombine.high %v1025_v54, %v1029_v55 }
 0x1f3   :  { %1480 = vmatprep.subr.bf16.mxu1 %v1819_v4  ;;  %v1829_v4 = vcombine.high %v1017_v62, %v1021_v63 }
 0x1f6   :  { %1481 = vmatpush1.bf16.msra.mxu1 %v1818_v3  ;;  %v1838_v3 = vcombine.low %v1026_v56, %v1030_v57 }
 0x1f7   :  { %1482 = vmatprep.subr.bf16.mxu1 %v1811_v12  ;;  %v1821_v12 = vcombine.high %v1009_v6, %v1013_v7 }
 0x1fa   :  { %1483 = vmatpush1.bf16.msra.mxu1 %v1810_v11  ;;  %v1830_v11 = vcombine.low %v1018_v0, %v1022_v1 }
 0x1fb   :  { %1554 = vmatprep.subr.bf16.mxu1 %v1871_v21 }
 0x29d   :  { %v989_v23 = vpop.f32.mrf.mxu1 }
 0x29e   :  { %v990_v25 = vadd.f32 %v1799_v22, %v989_v23 }
 0x29f   :  { %v2032_v24 = vpop.f32.mrf.mxu1 }
 0x2a0   :  { %v996_v33 = vmax.f32 %v990_v25, 0.0  ;;  %v1065_v24 = vlaneseq }
 0x2a1   :  { %v992_v26 = vpop.f32.mrf.mxu1 }
 0x2a2   :  { %v993_v27 = vadd.f32 %v1799_v22, %v992_v26  ;;  %v1812_v22 = vcombine.low %v1001_v14, %v1005_v15  ;;  %v2734_v25 = vshrl.u32 %v1065_v24, 7 }
 0x2a3   :  { %v2033_v29 = vpop.f32.mrf.mxu1 }
 0x2a4   :  { %v997_v34 = vmax.f32 %v993_v27, 0.0  ;;  %v1067_v26 = vsub.s32 0, %v2734_v25  ;;  %v1075_v27 = vsub.s32 2, %v2734_v25  ;;  %v1071_v29 = vsub.s32 1, %v2734_v25 }
 0x2a5   :  { %v1079_v30 = vsub.s32 3, %v2734_v25 }
 0x2a6   :  { %v2656_v35 = vpack.c.bf16 %v997_v34, %v996_v33  ;;  %v1068_v31 = vrot.slane %v2741_v28, %v1067_v26  ;;  %v1076_v32 = vrot.slane %v2741_v28, %v1075_v27  ;;  %v1072_v33 = vrot.slane %v2741_v28, %v1071_v29 }
 0x2a7   :  { %v1080_v34 = vrot.slane %v2741_v28, %v1079_v30 }
 0x2a8   :  { %1458 = vmatmul.mubr.bf16.vlgmr.msra.gmra.mxu0 %v2656_v35  ;;  %1501 = vmatmul.mubr.bf16.vlgmr.msra.gmra.mxu1 %v2656_v35 }
 0x2a9   :  { %1512 = vmatpush1.bf16.msra.mxu0 %v1868_v16  ;;  %1555 = vmatpush1.bf16.msra.mxu1 %v1870_v20  ;;  %v1002_v16 = vld [vmem:[%s2810_s7 + $0x18] sm:$0xff]  ;;  %v1813_v20 = vcombine.high %v1001_v14, %v1005_v15  ;;  %v1095_v14 = vsub.s32 7, %v2734_v25 }
 0x2aa   :  { %1513 = vmatprep.subr.bf16.mxu0 %v1861_v36  ;;  %1556 = vmatprep.subr.bf16.mxu1 %v1863_v37  ;;  %v1815_v21 = vcombine.high %v1002_v16, %v1006_v17  ;;  %v1814_v23 = vcombine.low %v1002_v16, %v1006_v17 }
 0x2ab   :  { %1543 = vmatprep.mubr.bf16.mxu0 %v2183_v19  ;;  %1586 = vmatprep.mubr.bf16.mxu1 %v2183_v19  ;;  %v1822_v19 = vcombine.low %v1010_v8, %v1014_v9 }
 0x2ad   :  { %1514 = vmatpush1.bf16.msra.mxu0 %v1860_v42  ;;  %1557 = vmatpush1.bf16.msra.mxu1 %v1862_v43 }
 0x2ae   :  { %1515 = vmatprep.subr.bf16.mxu0 %v1853_v44  ;;  %1558 = vmatprep.subr.bf16.mxu1 %v1855_v45 }
 0x2b1   :  { %1516 = vmatpush1.bf16.msra.mxu0 %v1852_v50  ;;  %1559 = vmatpush1.bf16.msra.mxu1 %v1854_v51 }
 0x2b2   :  { %1517 = vmatprep.subr.bf16.mxu0 %v1845_v52  ;;  %1560 = vmatprep.subr.bf16.mxu1 %v1847_v53 }
 0x2b5   :  { %1518 = vmatpush1.bf16.msra.mxu0 %v1844_v58  ;;  %1561 = vmatpush1.bf16.msra.mxu1 %v1846_v59 }
 0x2b6   :  { %1519 = vmatprep.subr.bf16.mxu0 %v1837_v60  ;;  %1562 = vmatprep.subr.bf16.mxu1 %v1839_v61 }
 0x2b9   :  { %1520 = vmatpush1.bf16.msra.mxu0 %v1836_v2  ;;  %1563 = vmatpush1.bf16.msra.mxu1 %v1838_v3 }
 0x2ba   :  { %1521 = vmatprep.subr.bf16.mxu0 %v1829_v4  ;;  %1564 = vmatprep.subr.bf16.mxu1 %v1831_v5 }
 0x2bd   :  { %1522 = vmatpush1.bf16.msra.mxu0 %v1828_v10  ;;  %1565 = vmatpush1.bf16.msra.mxu1 %v1830_v11  ;;  %v1083_v10 = vsub.s32 4, %v2734_v25  ;;  %v1091_v11 = vsub.s32 6, %v2734_v25 }
 0x2be   :  { %1523 = vmatprep.subr.bf16.mxu0 %v1821_v12  ;;  %1566 = vmatprep.subr.bf16.mxu1 %v1823_v13  ;;  %v1087_v13 = vsub.s32 5, %v2734_v25 }
 0x2bf   :  { %v1084_v15 = vrot.slane %v2741_v28, %v1083_v10  ;;  %v1092_v16 = vrot.slane %v2741_v28, %v1091_v11 }
 0x2c0   :  { %v1088_v17 = vrot.slane %v2741_v28, %v1087_v13 }
 0x2c1   :  { %1524 = vmatpush1.bf16.msra.mxu0 %v1820_v18  ;;  %1567 = vmatpush1.bf16.msra.mxu1 %v1822_v19  ;;  %v1096_v18 = vrot.slane %v2741_v28, %v1095_v14 }
 0x2c2   :  { %1525 = vmatprep.subr.bf16.mxu0 %v1813_v20  ;;  %1568 = vmatprep.subr.bf16.mxu1 %v1815_v21 }
 0x2c5   :  { %1526 = vmatpush1.bf16.msra.mxu0 %v1812_v22  ;;  %1569 = vmatpush1.bf16.msra.mxu1 %v1814_v23 }
 0x2c8   :  { %1544 = vmatmul.mubr.bf16.vlgmr.msra.gmra.mxu0 %v2656_v35  ;;  %1587 = vmatmul.mubr.bf16.vlgmr.msra.gmra.mxu1 %v2656_v35 }
 0x368   :  { %v1459_v35 = vpop.f32.mrf.mxu0  ;;  %v1502_v36 = vpop.f32.mrf.mxu1 }
 0x369   :  { %v1460_v37 = vadd.f32 %v1459_v35, %v1068_v31  ;;  %v1503_v38 = vadd.f32 %v1502_v36, %v1076_v32 }
 0x36a   :  { %v1461_v39 = vpop.f32.mrf.mxu0  ;;  %v1504_v40 = vpop.f32.mrf.mxu1 }
 0x36b   :  { %v1872_v41 = vmul.f32 -1.442695, %v1460_v37  ;;  %v1874_v42 = vmul.f32 -1.442695, %v1503_v38  ;;  %v1462_v43 = vadd.f32 %v1461_v39, %v1072_v33  ;;  %v1505_v44 = vadd.f32 %v1504_v40, %v1080_v34 }
 0x36c   :  { %v1463_v45 = vpop.f32.mrf.mxu0  ;;  %v1506_v46 = vpop.f32.mrf.mxu1 }
 0x36d   :  { %2117 = vpow2.f32 %v1872_v41  ;;  %v1873_v47 = vmul.f32 -1.442695, %v1462_v43  ;;  %v1875_v48 = vmul.f32 -1.442695, %v1505_v44  ;;  %v1464_v49 = vadd.f32 %v1463_v45, %v1068_v31 }
 0x36e   :  { %2119 = vpow2.f32 %v1874_v42  ;;  %v1507_v50 = vadd.f32 %v1506_v46, %v1076_v32  ;;  %v1465_v51 = vpop.f32.mrf.mxu0  ;;  %v1508_v52 = vpop.f32.mrf.mxu1 }
 0x36f   :  { %2121 = vpow2.f32 %v1873_v47  ;;  %v1880_v53 = vmul.f32 -1.442695, %v1464_v49  ;;  %v1466_v54 = vadd.f32 %v1465_v51, %v1072_v33  ;;  %v1509_v55 = vadd.f32 %v1508_v52, %v1080_v34 }
 0x370   :  { %2123 = vpow2.f32 %v1875_v48  ;;  %v1882_v56 = vmul.f32 -1.442695, %v1507_v50 }
 0x371   :  { %2125 = vpow2.f32 %v1880_v53  ;;  %v1881_v57 = vmul.f32 -1.442695, %v1466_v54  ;;  %v1883_v58 = vmul.f32 -1.442695, %v1509_v55 }
 0x372   :  { %2127 = vpow2.f32 %v1882_v56 }
 0x373   :  { %2129 = vpow2.f32 %v1881_v57 }
 0x374   :  { %2131 = vpow2.f32 %v1883_v58 }
 0x37a   :  { %v2118_v59 = vpop.eup %2117 }
 0x37b   :  { %v2120_v60 = vpop.eup %2119  ;;  %v1645_v61 = vadd.f32 1.0, %v2118_v59 }
 0x37c   :  { %v2122_v62 = vpop.eup %2121  ;;  %v1647_v63 = vadd.f32 1.0, %v2120_v60 }
 0x37d   :  { %v2124_v0 = vpop.eup %2123  ;;  %2133 = vrcp.f32 %v1645_v61  ;;  %v1646_v1 = vadd.f32 1.0, %v2122_v62 }
 0x37e   :  { %v2126_v2 = vpop.eup %2125  ;;  %2135 = vrcp.f32 %v1647_v63  ;;  %v1648_v3 = vadd.f32 1.0, %v2124_v0 }
 0x37f   :  { %v2128_v4 = vpop.eup %2127  ;;  %2137 = vrcp.f32 %v1646_v1  ;;  %v1653_v5 = vadd.f32 1.0, %v2126_v2 }
 0x380   :  { %v2130_v6 = vpop.eup %2129  ;;  %2139 = vrcp.f32 %v1648_v3  ;;  %v1655_v7 = vadd.f32 1.0, %v2128_v4 }
 0x381   :  { %v2132_v8 = vpop.eup %2131  ;;  %2141 = vrcp.f32 %v1653_v5  ;;  %v1654_v9 = vadd.f32 1.0, %v2130_v6 }
 0x382   :  { %2143 = vrcp.f32 %v1655_v7  ;;  %v1656_v12 = vadd.f32 1.0, %v2132_v8 }
 0x383   :  { %2145 = vrcp.f32 %v1654_v9 }
 0x384   :  { %2147 = vrcp.f32 %v1656_v12 }
 0x388   :  { %v1545_v19 = vpop.f32.mrf.mxu0  ;;  %v1588_v20 = vpop.f32.mrf.mxu1 }
 0x389   :  { %v1546_v21 = vadd.f32 %v1545_v19, %v1084_v15  ;;  %v1589_v22 = vadd.f32 %v1588_v20, %v1092_v16 }
 0x38a   :  { %v2134_v23 = vpop.eup %2133  ;;  %v1547_v24 = vpop.f32.mrf.mxu0 }
 0x38b   :  { %v1590_v26 = vpop.f32.mrf.mxu1  ;;  %v2136_v27 = vpop.eup %2135  ;;  %1693 = vst [vmem:[%s2815_s9] sm:$0xff] %v2134_v23  ;;  %v1876_v25 = vmul.f32 -1.442695, %v1546_v21  ;;  %v1878_v29 = vmul.f32 -1.442695, %v1589_v22  ;;  %v1548_v30 = vadd.f32 %v1547_v24, %v1088_v17 }
 0x38c   :  { %v1591_v31 = vadd.f32 %v1590_v26, %v1096_v18  ;;  %v2138_v32 = vpop.eup %2137  ;;  %1695 = vst [vmem:[%s2815_s9 + $0x10] sm:$0xff] %v2136_v27  ;;  %v1549_v28 = vpop.f32.mrf.mxu0 }
 0x38d   :  { %v1592_v33 = vpop.f32.mrf.mxu1  ;;  %v2140_v34 = vpop.eup %2139  ;;  %1694 = vst [vmem:[%s2815_s9 + $0x8] sm:$0xff] %v2138_v32  ;;  %2149 = vpow2.f32 %v1876_v25  ;;  %v1877_v35 = vmul.f32 -1.442695, %v1548_v30  ;;  %v1550_v37 = vadd.f32 %v1549_v28, %v1084_v15 }
 0x38e   :  { %v1879_v36 = vmul.f32 -1.442695, %v1591_v31  ;;  %v2142_v38 = vpop.eup %2141  ;;  %1696 = vst [vmem:[%s2815_s9 + $0x18] sm:$0xff] %v2140_v34  ;;  %2151 = vpow2.f32 %v1878_v29  ;;  %v1593_v39 = vadd.f32 %v1592_v33, %v1092_v16  ;;  %v1551_v40 = vpop.f32.mrf.mxu0 }
 0x38f   :  { %v1594_v41 = vpop.f32.mrf.mxu1  ;;  %v2144_v42 = vpop.eup %2143  ;;  %1701 = vst [vmem:[%s2815_s9 + $0x40] sm:$0xff] %v2142_v38  ;;  %2153 = vpow2.f32 %v1877_v35  ;;  %v1884_v43 = vmul.f32 -1.442695, %v1550_v37  ;;  %v1552_v44 = vadd.f32 %v1551_v40, %v1088_v17 }
 0x390   :  { %v1595_v45 = vadd.f32 %v1594_v41, %v1096_v18  ;;  %v2146_v46 = vpop.eup %2145  ;;  %1703 = vst [vmem:[%s2815_s9 + $0x50] sm:$0xff] %v2144_v42  ;;  %2155 = vpow2.f32 %v1879_v36  ;;  %v1886_v47 = vmul.f32 -1.442695, %v1593_v39 }
 0x391   :  { %v2148_v48 = vpop.eup %2147  ;;  %1702 = vst [vmem:[%s2815_s9 + $0x48] sm:$0xff] %v2146_v46  ;;  %2157 = vpow2.f32 %v1884_v43  ;;  %v1885_v49 = vmul.f32 -1.442695, %v1552_v44 }
 0x392   :  { %v1887_v50 = vmul.f32 -1.442695, %v1595_v45  ;;  %1704 = vst [vmem:[%s2815_s9 + $0x58] sm:$0xff] %v2148_v48  ;;  %2159 = vpow2.f32 %v1886_v47 }
 0x393   :  { %2161 = vpow2.f32 %v1885_v49 }
 0x394   :  { %2163 = vpow2.f32 %v1887_v50 }
 0x39a   :  { %v2150_v51 = vpop.eup %2149 }
 0x39b   :  { %v2152_v52 = vpop.eup %2151  ;;  %v1649_v53 = vadd.f32 1.0, %v2150_v51 }
 0x39c   :  { %v2154_v54 = vpop.eup %2153  ;;  %v1651_v55 = vadd.f32 1.0, %v2152_v52 }
 0x39d   :  { %v2156_v56 = vpop.eup %2155  ;;  %2165 = vrcp.f32 %v1649_v53  ;;  %v1650_v57 = vadd.f32 1.0, %v2154_v54 }
 0x39e   :  { %v2158_v58 = vpop.eup %2157  ;;  %2167 = vrcp.f32 %v1651_v55  ;;  %v1652_v59 = vadd.f32 1.0, %v2156_v56 }
 0x39f   :  { %v2160_v60 = vpop.eup %2159  ;;  %2169 = vrcp.f32 %v1650_v57  ;;  %v1657_v61 = vadd.f32 1.0, %v2158_v58 }
 0x3a0   :  { %v2162_v62 = vpop.eup %2161  ;;  %2171 = vrcp.f32 %v1652_v59  ;;  %v1659_v63 = vadd.f32 1.0, %v2160_v60 }
 0x3a1   :  { %v2164_v0 = vpop.eup %2163  ;;  %2173 = vrcp.f32 %v1657_v61  ;;  %v1658_v1 = vadd.f32 1.0, %v2162_v62 }
 0x3a2   :  { %2175 = vrcp.f32 %v1659_v63  ;;  %v1660_v2 = vadd.f32 1.0, %v2164_v0 }
 0x3a3   :  { %2177 = vrcp.f32 %v1658_v1 }
 0x3a4   :  { %2179 = vrcp.f32 %v1660_v2 }
 0x3aa   :  { %v2166_v3 = vpop.eup %2165 }
 0x3ab   :  { %v2168_v4 = vpop.eup %2167  ;;  %1697 = vst [vmem:[%s2815_s9 + $0x20] sm:$0xff] %v2166_v3 }
 0x3ac   :  { %v2170_v5 = vpop.eup %2169  ;;  %1699 = vst [vmem:[%s2815_s9 + $0x30] sm:$0xff] %v2168_v4 }
 0x3ad   :  { %v2172_v6 = vpop.eup %2171  ;;  %1698 = vst [vmem:[%s2815_s9 + $0x28] sm:$0xff] %v2170_v5 }
 0x3ae   :  { %v2174_v7 = vpop.eup %2173  ;;  %1700 = vst [vmem:[%s2815_s9 + $0x38] sm:$0xff] %v2172_v6 }
 0x3af   :  { %v2176_v8 = vpop.eup %2175  ;;  %1705 = vst [vmem:[%s2815_s9 + $0x60] sm:$0xff] %v2174_v7 }
 0x3b0   :  { %v2178_v9 = vpop.eup %2177  ;;  %1707 = vst [vmem:[%s2815_s9 + $0x70] sm:$0xff] %v2176_v8 }
 0x3b1   :  { %v2180_v10 = vpop.eup %2179  ;;  %1706 = vst [vmem:[%s2815_s9 + $0x68] sm:$0xff] %v2178_v9 }
 0x3b2   :  { %1708 = vst [vmem:[%s2815_s9 + $0x78] sm:$0xff] %v2180_v10 }

</bundles_post_ra>
